<compile_context>
chip_gen: v7x
topology: tpu7x:2x2x1
jax: 0.10.0
libtpu: 0.0.40
codegen_flags: <defaults>
</compile_context>

<pallas_src>
import functools

import jax
import jax.numpy as jnp
from jax import lax
from jax.experimental import pallas as pl
from jax.experimental.pallas import tpu as pltpu

EMBEDDING_WIDTH = 60.0
LANES = 128
SUBLANES = 8
_MAX_TILE_ROWS = 4096   # 4096*128*4B = 2 MiB per f32 input per pipeline buffer
_NUM_CORES = 2          # v7x has 2 TensorCores; extra axis is harmless on 1-TC chips


def _cdiv(a, b):
    return -(-a // b)


def _vae_loss_kernel(xr_ref, x_ref, mu_ref, lv_ref, out_ref, *,
                     tile_r, tiles_per_core, rows_valid, bce_scale,
                     binary_targets):
    c = pl.program_id(0)   # core ("parallel") axis
    t = pl.program_id(1)   # row-tile ("arbitrary", accumulation) axis

    @pl.when(t == 0)
    def _init():
        out_ref[...] = jnp.zeros_like(out_ref)

    xr = xr_ref[...].astype(jnp.float32)
    x = x_ref[...].astype(jnp.float32)

    if binary_targets:
        # One log/element; exact only for hard {0,1} targets (gated by flag).
        sel = jnp.where(x >= 0.5, xr, 1.0 - xr)
        term = jnp.maximum(jnp.log(sel), -100.0)
    else:
        # x*log(xr) + (1-x)*log(1-xr) == x*(log(xr) - log(1-xr)) + log(1-xr)
        log_xr = jnp.maximum(jnp.log(xr), -100.0)
        log_1m = jnp.maximum(jnp.log(1.0 - xr), -100.0)
        term = x * (log_xr - log_1m) + log_1m

    # Zero out rows past the real array: the ragged last tile and the
    # duplicated (clamped) block a core sees when the block count is odd.
    # The select also kills NaN/garbage from the unfilled part of the buffer.
    base = (c * tiles_per_core + t) * tile_r
    row_ids = base + lax.broadcasted_iota(jnp.int32, (tile_r, 1), 0)
    term = jnp.where(row_ids < rows_valid, term, 0.0)

    # Fold the tile into a single (8,128) vreg (pure VPU adds) and accumulate
    # into this core's resident output block, pre-scaled to loss units
    # (bce_scale = -embedding_width / n_elem).
    partial = jnp.sum(term.reshape(-1, SUBLANES, LANES), axis=0)
    out_ref[0] += bce_scale * partial

    # KLD is tiny; fold it into core 0's partial block once, at its last step.
    @pl.when(jnp.logical_and(c == 0, t == tiles_per_core - 1))
    def _add_kld():
        mu = mu_ref[...].astype(jnp.float32)
        lv = lv_ref[...].astype(jnp.float32)
        kld = -0.5 * jnp.sum(1.0 + lv - mu * mu - jnp.exp(lv))
        first = jnp.logical_and(
            lax.broadcasted_iota(jnp.int32, (SUBLANES, LANES), 0) == 0,
            lax.broadcasted_iota(jnp.int32, (SUBLANES, LANES), 1) == 0)
        out_ref[0] += jnp.where(first, kld, 0.0)


def custom_loss(x_recon, x, mu, logvar, *, binary_targets=False,
                max_tile_rows=_MAX_TILE_ROWS):
    """JAX/Pallas equivalent of customLoss.forward. Returns a scalar float32."""
    assert x.shape == x_recon.shape
    n_elem = int(x_recon.size)

    # Lane-dense (rows, 128) slab.  When n_elem is 1024-aligned this is a free
    # reshape of the contiguous flatten (no HBM copy); otherwise pad minimally
    # with (xr=1, x=1), which contributes exactly 0 to the BCE sum.
    align = SUBLANES * LANES
    xr_flat = x_recon.reshape(-1)
    x_flat = x.reshape(-1)
    if n_elem % align != 0:
        pad = align - n_elem % align
        xr_flat = jnp.pad(xr_flat, (0, pad), constant_values=1.0)
        x_flat = jnp.pad(x_flat, (0, pad), constant_values=1.0)
    xr2 = xr_flat.reshape(-1, LANES)
    x2 = x_flat.reshape(-1, LANES)
    rows = xr2.shape[0]                      # multiple of 8 by construction

    max_tile_rows = max(SUBLANES, (int(max_tile_rows) // SUBLANES) * SUBLANES)
    tile_r = min(max_tile_rows, rows)        # multiple of 8
    nblocks = _cdiv(rows, tile_r)
    num_cores = min(_NUM_CORES, nblocks)
    tiles_per_core = _cdiv(nblocks, num_cores)

    mu2 = mu.reshape(-1, mu.shape[-1])
    lv2 = logvar.reshape(-1, logvar.shape[-1])

    kernel = functools.partial(
        _vae_loss_kernel,
        tile_r=tile_r, tiles_per_core=tiles_per_core, rows_valid=rows,
        bce_scale=-EMBEDDING_WIDTH / float(n_elem),
        binary_targets=binary_targets)

    def _in_map(c, t):
        # Clamp so a core never requests a block past the array; the in-kernel
        # row mask zeroes the duplicated block's contribution.
        return (jnp.minimum(c * tiles_per_core + t, nblocks - 1), 0)

    n_proc = num_cores * tiles_per_core * tile_r * LANES
    cost = pl.CostEstimate(
        flops=9 * n_proc + 5 * int(mu2.size),
        transcendentals=(1 if binary_targets else 2) * n_proc + int(mu2.size),
        bytes_accessed=int(xr2.size * xr2.dtype.itemsize
                           + x2.size * x2.dtype.itemsize
                           + mu2.size * mu2.dtype.itemsize
                           + lv2.size * lv2.dtype.itemsize
                           + num_cores * SUBLANES * LANES * 4))

    # Real footprint: 2 big inputs x 2 pipeline buffers x one tile, plus an
    # allowance for Mosaic's f32 elementwise temporaries and small blocks.
    pipeline_bytes = 2 * tile_r * LANES * (xr2.dtype.itemsize + x2.dtype.itemsize)
    vmem_limit = min(int(pipeline_bytes + 8 * tile_r * LANES * 4 + (2 << 20)),
                     48 * 1024 * 1024)

    partial = pl.pallas_call(
        kernel,
        out_shape=jax.ShapeDtypeStruct((num_cores, SUBLANES, LANES), jnp.float32),
        grid=(num_cores, tiles_per_core),
        in_specs=[
            pl.BlockSpec((tile_r, LANES), _in_map),
            pl.BlockSpec((tile_r, LANES), _in_map),
            pl.BlockSpec(mu2.shape, lambda c, t: (0, 0)),   # tiny, resident
            pl.BlockSpec(lv2.shape, lambda c, t: (0, 0)),
        ],
        out_specs=pl.BlockSpec((1, SUBLANES, LANES), lambda c, t: (c, 0, 0)),
        compiler_params=pltpu.CompilerParams(
            dimension_semantics=("parallel", "arbitrary"),
            vmem_limit_bytes=vmem_limit,
        ),
        cost_estimate=cost,
    )(xr2, x2, mu2, lv2)

    # Each core's (8,128) block is already in final loss units (KLD folded in
    # on core 0); the only wrapper work is adding the per-core partials.
    return jnp.sum(partial)


def _reference(x_recon, x, mu, logvar):
    xr = x_recon.astype(jnp.float32)
    xt = x.astype(jnp.float32)
    log_xr = jnp.maximum(jnp.log(xr), -100.0)
    log_1m = jnp.maximum(jnp.log(1.0 - xr), -100.0)
    bce = -jnp.mean(xt * log_xr + (1.0 - xt) * log_1m)
    kld = -0.5 * jnp.sum(1.0 + logvar - mu**2 - jnp.exp(logvar))
    return EMBEDDING_WIDTH * bce + kld


if __name__ == "__main__":
    key = jax.random.PRNGKey(0)
    k1, k2, k3, k4 = jax.random.split(key, 4)

    batch, seq, vocab, latent = 2, 8, 60, 32   # embedding_width = 60 feature dim

    # x_recon: probabilities in (0,1); x: {0,1} targets (BCE inputs).
    x_recon = jax.nn.sigmoid(jax.random.normal(k1, (batch, seq, vocab), jnp.float32))
    x = (jax.random.uniform(k2, (batch, seq, vocab)) > 0.5).astype(jnp.float32)
    mu = jax.random.normal(k3, (batch, latent), jnp.float32)
    logvar = 0.1 * jax.random.normal(k4, (batch, latent), jnp.float32)

    ref = _reference(x_recon, x, mu, logvar)

    # 1) Default path (exact BCE semantics, safe for soft targets).
    loss = custom_loss(x_recon, x, mu, logvar)
    jax.block_until_ready(loss)
    assert jnp.allclose(loss, ref, rtol=1e-5, atol=1e-5), (loss, ref)

    # 2) Binary-target fast path (one log/element; exact for {0,1} targets).
    loss_bin = custom_loss(x_recon, x, mu, logvar, binary_targets=True)
    jax.block_until_ready(loss_bin)
    assert jnp.allclose(loss_bin, ref, rtol=1e-5, atol=1e-5), (loss_bin, ref)

    # 3) Multi-tile / 2-core / ragged-tile path (small tile to force several
    #    grid steps, a ragged last block and a clamped phantom block).
    b2, s2 = 4, 20
    xr3 = jax.nn.sigmoid(jax.random.normal(k1, (b2, s2, vocab), jnp.float32))
    x3 = (jax.random.uniform(k2, (b2, s2, vocab)) > 0.5).astype(jnp.float32)
    ref3 = _reference(xr3, x3, mu, logvar)
    loss3 = custom_loss(xr3, x3, mu, logvar, max_tile_rows=16)
    jax.block_until_ready(loss3)
    assert jnp.allclose(loss3, ref3, rtol=1e-5, atol=1e-5), (loss3, ref3)

    print("KERNEL_OK")
</pallas_src>

<mosaic_0001>
module attributes {stable_mosaic.version = 11 : i64} {
  func.func @_vae_loss_kernel(%arg0: i32, %arg1: i32, %arg2: memref<8x128xf32, #tpu.memory_space<vmem>>, %arg3: memref<8x128xf32, #tpu.memory_space<vmem>>, %arg4: memref<2x32xf32, #tpu.memory_space<vmem>>, %arg5: memref<2x32xf32, #tpu.memory_space<vmem>>, %arg6: memref<1x8x128xf32, #tpu.memory_space<vmem>>) attributes {dimension_semantics = [#tpu.dimension_semantics<parallel>, #tpu.dimension_semantics<arbitrary>], iteration_bounds = array<i64: 1, 1>, scalar_prefetch = 0 : i64, scratch_operands = 0 : i64, tpu.core_type = #tpu.core_type<tc>, window_params = [{transform_indices = @transform_0, window_bounds = array<i64: 8, 128>}, {transform_indices = @transform_1, window_bounds = array<i64: 8, 128>}, {pipeline_mode = #tpu.pipeline_mode<synchronous>, transform_indices = @transform_2, window_bounds = array<i64: 2, 32>}, {pipeline_mode = #tpu.pipeline_mode<synchronous>, transform_indices = @transform_3, window_bounds = array<i64: 2, 32>}, {transform_indices = @transform_4, window_bounds = array<i64: 1, 8, 128>}]} {
    %c0_i32 = arith.constant 0 : i32
    %0 = arith.cmpi eq, %arg1, %c0_i32 : i32
    %1 = arith.extui %0 : i1 to i32
    %c0_i32_0 = arith.constant 0 : i32
    %2 = arith.cmpi ne, %1, %c0_i32_0 : i32
    scf.if %2 {
      %cst_19 = arith.constant 0.000000e+00 : f32
      %43 = vector.broadcast %cst_19 : f32 to vector<1x8x128xf32>
      %c0_20 = arith.constant 0 : index
      %c0_21 = arith.constant 0 : index
      %c0_22 = arith.constant 0 : index
      %44 = vector.load %arg6[%c0_20, %c0_21, %c0_22] : memref<1x8x128xf32, #tpu.memory_space<vmem>>, vector<1x8x128xf32>
      tpu.vector_store %arg6[%c0_20, %c0_21, %c0_22], %43 {strides = array<i32>} : memref<1x8x128xf32, #tpu.memory_space<vmem>>, vector<1x8x128xf32>,
    } else {
    }
    %c0 = arith.constant 0 : index
    %c0_1 = arith.constant 0 : index
    %3 = vector.load %arg2[%c0, %c0_1] : memref<8x128xf32, #tpu.memory_space<vmem>>, vector<8x128xf32>
    %c0_2 = arith.constant 0 : index
    %c0_3 = arith.constant 0 : index
    %4 = vector.load %arg3[%c0_2, %c0_3] : memref<8x128xf32, #tpu.memory_space<vmem>>, vector<8x128xf32>
    %5 = math.log %3 : vector<8x128xf32>
    %cst = arith.constant -1.000000e+02 : f32
    %6 = vector.broadcast %cst : f32 to vector<8x128xf32>
    %7 = arith.maximumf %5, %6 : vector<8x128xf32>
    %cst_4 = arith.constant 1.000000e+00 : f32
    %8 = vector.broadcast %cst_4 : f32 to vector<8x128xf32>
    %9 = arith.subf %8, %3 : vector<8x128xf32>
    %10 = math.log %9 : vector<8x128xf32>
    %cst_5 = arith.constant -1.000000e+02 : f32
    %11 = vector.broadcast %cst_5 : f32 to vector<8x128xf32>
    %12 = arith.maximumf %10, %11 : vector<8x128xf32>
    %13 = arith.subf %7, %12 : vector<8x128xf32>
    %14 = arith.mulf %4, %13 : vector<8x128xf32>
    %15 = arith.addf %14, %12 : vector<8x128xf32>
    %c1_i32 = arith.constant 1 : i32
    %16 = arith.muli %arg0, %c1_i32 : i32
    %17 = arith.addi %16, %arg1 : i32
    %c8_i32 = arith.constant 8 : i32
    %18 = arith.muli %17, %c8_i32 : i32
    %19 = tpu.iota {dimensions = array<i32: 0>} : vector<8x1xi32>
    %20 = vector.broadcast %18 : i32 to vector<8x1xi32>
    %21 = arith.addi %20, %19 : vector<8x1xi32>
    %c8_i32_6 = arith.constant 8 : i32
    %22 = vector.broadcast %c8_i32_6 : i32 to vector<8x1xi32>
    %23 = arith.cmpi slt, %21, %22 : vector<8x1xi32>
    %cst_7 = arith.constant 0.000000e+00 : f32
    %24 = vector.shape_cast %23 : vector<8x1xi1> to vector<8x1xi1>
    %25 = vector.broadcast %24 : vector<8x1xi1> to vector<8x128xi1>
    %26 = vector.broadcast %cst_7 : f32 to vector<8x128xf32>
    %27 = arith.select %25, %15, %26 : vector<8x128xi1>, vector<8x128xf32>
    %28 = vector.shape_cast %27 : vector<8x128xf32> to vector<1x8x128xf32>
    %cst_8 = arith.constant dense<0.000000e+00> : vector<8x128xf32>
    %29 = vector.multi_reduction <add>, %28, %cst_8 [0] : vector<1x8x128xf32> to vector<8x128xf32>
    %c0_9 = arith.constant 0 : index
    %c0_10 = arith.constant 0 : index
    %c0_11 = arith.constant 0 : index
    %30 = vector.load %arg6[%c0_9, %c0_10, %c0_11] : memref<1x8x128xf32, #tpu.memory_space<vmem>>, vector<1x8x128xf32>
    %31 = vector.shape_cast %30 : vector<1x8x128xf32> to vector<8x128xf32>
    %cst_12 = arith.constant -6.250000e-02 : f32
    %32 = vector.broadcast %cst_12 : f32 to vector<8x128xf32>
    %33 = arith.mulf %32, %29 : vector<8x128xf32>
    %34 = arith.addf %31, %33 : vector<8x128xf32>
    %c0_13 = arith.constant 0 : index
    %c0_14 = arith.constant 0 : index
    %c0_15 = arith.constant 0 : index
    %35 = vector.load %arg6[%c0_13, %c0_14, %c0_15] : memref<1x8x128xf32, #tpu.memory_space<vmem>>, vector<1x8x128xf32>
    %36 = vector.shape_cast %35 : vector<1x8x128xf32> to vector<8x128xf32>
    %37 = vector.shape_cast %34 : vector<8x128xf32> to vector<1x8x128xf32>
    tpu.vector_store %arg6[%c0_13, %c0_14, %c0_15], %37 {strides = array<i32>} : memref<1x8x128xf32, #tpu.memory_space<vmem>>, vector<1x8x128xf32>,
    %c0_i32_16 = arith.constant 0 : i32
    %38 = arith.cmpi eq, %arg0, %c0_i32_16 : i32
    %c0_i32_17 = arith.constant 0 : i32
    %39 = arith.cmpi eq, %arg1, %c0_i32_17 : i32
    %40 = arith.andi %38, %39 : i1
    %41 = arith.extui %40 : i1 to i32
    %c0_i32_18 = arith.constant 0 : i32
    %42 = arith.cmpi ne, %41, %c0_i32_18 : i32
    scf.if %42 {
      %c0_19 = arith.constant 0 : index
      %c0_20 = arith.constant 0 : index
      %43 = vector.load %arg4[%c0_19, %c0_20] : memref<2x32xf32, #tpu.memory_space<vmem>>, vector<2x32xf32>
      %c0_21 = arith.constant 0 : index
      %c0_22 = arith.constant 0 : index
      %44 = vector.load %arg5[%c0_21, %c0_22] : memref<2x32xf32, #tpu.memory_space<vmem>>, vector<2x32xf32>
      %cst_23 = arith.constant 1.000000e+00 : f32
      %45 = vector.broadcast %cst_23 : f32 to vector<2x32xf32>
      %46 = arith.addf %45, %44 : vector<2x32xf32>
      %47 = arith.mulf %43, %43 : vector<2x32xf32>
      %48 = arith.subf %46, %47 : vector<2x32xf32>
      %49 = math.exp %44 : vector<2x32xf32>
      %50 = arith.subf %48, %49 : vector<2x32xf32>
      %51 = vector.shape_cast %50 : vector<2x32xf32> to vector<1x2x32xf32>
      %cst_24 = arith.constant dense<0.000000e+00> : vector<1xf32>
      %52 = vector.multi_reduction <add>, %51, %cst_24 [1, 2] : vector<1x2x32xf32> to vector<1xf32>
      %53 = vector.shape_cast %52 : vector<1xf32> to vector<1x1x1xf32>
      %54 = vector.extract %53[0, 0, 0] : f32 from vector<1x1x1xf32>
      %cst_25 = arith.constant -5.000000e-01 : f32
      %55 = arith.mulf %cst_25, %54 : f32
      %56 = tpu.iota {dimensions = array<i32: 0>} : vector<8x128xi32>
      %c0_i32_26 = arith.constant 0 : i32
      %57 = vector.broadcast %c0_i32_26 : i32 to vector<8x128xi32>
      %58 = arith.cmpi eq, %56, %57 : vector<8x128xi32>
      %59 = tpu.iota {dimensions = array<i32: 1>} : vector<8x128xi32>
      %c0_i32_27 = arith.constant 0 : i32
      %60 = vector.broadcast %c0_i32_27 : i32 to vector<8x128xi32>
      %61 = arith.cmpi eq, %59, %60 : vector<8x128xi32>
      %62 = arith.andi %58, %61 : vector<8x128xi1>
      %c0_28 = arith.constant 0 : index
      %c0_29 = arith.constant 0 : index
      %c0_30 = arith.constant 0 : index
      %63 = vector.load %arg6[%c0_28, %c0_29, %c0_30] : memref<1x8x128xf32, #tpu.memory_space<vmem>>, vector<1x8x128xf32>
      %64 = vector.shape_cast %63 : vector<1x8x128xf32> to vector<8x128xf32>
      %cst_31 = arith.constant 0.000000e+00 : f32
      %65 = vector.broadcast %55 : f32 to vector<8x128xf32>
      %66 = vector.broadcast %cst_31 : f32 to vector<8x128xf32>
      %67 = arith.select %62, %65, %66 : vector<8x128xi1>, vector<8x128xf32>
      %68 = arith.addf %64, %67 : vector<8x128xf32>
      %c0_32 = arith.constant 0 : index
      %c0_33 = arith.constant 0 : index
      %c0_34 = arith.constant 0 : index
      %69 = vector.load %arg6[%c0_32, %c0_33, %c0_34] : memref<1x8x128xf32, #tpu.memory_space<vmem>>, vector<1x8x128xf32>
      %70 = vector.shape_cast %69 : vector<1x8x128xf32> to vector<8x128xf32>
      %71 = vector.shape_cast %68 : vector<8x128xf32> to vector<1x8x128xf32>
      tpu.vector_store %arg6[%c0_32, %c0_33, %c0_34], %71 {strides = array<i32>} : memref<1x8x128xf32, #tpu.memory_space<vmem>>, vector<1x8x128xf32>,
    } else {
    }
    return
  }
  func.func @transform_0(%arg0: i32, %arg1: i32) -> (i32, i32) {
    %c1_i32 = arith.constant 1 : i32
    %0 = arith.muli %arg0, %c1_i32 : i32
    %1 = arith.addi %0, %arg1 : i32
    %c0_i32 = arith.constant 0 : i32
    %2 = arith.minsi %1, %c0_i32 : i32
    %c0_i32_0 = arith.constant 0 : i32
    %c0_i32_1 = arith.constant 0 : i32
    return %2, %c0_i32_0 : i32, i32
  }
  func.func @transform_1(%arg0: i32, %arg1: i32) -> (i32, i32) {
    %c1_i32 = arith.constant 1 : i32
    %0 = arith.muli %arg0, %c1_i32 : i32
    %1 = arith.addi %0, %arg1 : i32
    %c0_i32 = arith.constant 0 : i32
    %2 = arith.minsi %1, %c0_i32 : i32
    %c0_i32_0 = arith.constant 0 : i32
    %c0_i32_1 = arith.constant 0 : i32
    return %2, %c0_i32_0 : i32, i32
  }
  func.func @transform_2(%arg0: i32, %arg1: i32) -> (i32, i32) {
    %c0_i32 = arith.constant 0 : i32
    %c0_i32_0 = arith.constant 0 : i32
    %c0_i32_1 = arith.constant 0 : i32
    return %c0_i32, %c0_i32_0 : i32, i32
  }
  func.func @transform_3(%arg0: i32, %arg1: i32) -> (i32, i32) {
    %c0_i32 = arith.constant 0 : i32
    %c0_i32_0 = arith.constant 0 : i32
    %c0_i32_1 = arith.constant 0 : i32
    return %c0_i32, %c0_i32_0 : i32, i32
  }
  func.func @transform_4(%arg0: i32, %arg1: i32) -> (i32, i32, i32) {
    %c0_i32 = arith.constant 0 : i32
    %c0_i32_0 = arith.constant 0 : i32
    %c0_i32_1 = arith.constant 0 : i32
    return %arg0, %c0_i32, %c0_i32_0 : i32, i32, i32
  }
}

</mosaic_0001>

<bundles_post_ra>
// kernel: tpu_custom_call.1
= control target key start
LH: loop header
LB: loop body
LE: loop exit
PB: predicated region body
PF: predicated region fallthrough
CT: control target
= control target key end

     0   :  { %9 = vsyncpa [#allocation3], 0  ;;  %s299_s0 = inlined_call_operand.hbm [shape: f32[8,128], index: 0, kind: input, shape index: {}]   ;;  %s300_s1 = inlined_call_operand.hbm [shape: f32[8,128], index: 1, kind: input, shape index: {}]   ;;  %s301_s2 = inlined_call_operand.vmem [shape: f32[2,32], index: 2, kind: input, shape index: {}]   ;;  %s302_s3 = inlined_call_operand.vmem [shape: f32[2,32], index: 3, kind: input, shape index: {}]   ;;  %s303_s4 = inlined_call_operand.hbm [shape: f32[1,8,128], index: 4, kind: output, shape index: {}]  }
   0x1   :  { %10 = vsyncpa [#allocation6], 0 }
   0x2   :  { %11 = vsyncpa [#allocation4], 0  ;;  %s229_s15 = smov [#allocation2]   ;;  %s230_s17 = smov [#allocation5]  }
   0x3   :  { %s23_s16 = sshll.u32 %s229_s15, 4  ;;  %s38_s18 = sshll.u32 %s230_s17, 4  ;;  %s24_s16 = int_to_ptr.vmem [resolvable:$true] %s23_s16  ;;  %s39_s18 = int_to_ptr.vmem [resolvable:$true] %s38_s18 }
   0x4   :  { %s157_s21 = scalar_lea.hbm %s299_s0, 128 }
   0x5   :  { %p158_p0 = scmp.ne.s32.totalorder %s299_s0, %s157_s21  ;;  %p161_p1 = scmp.lt.u32.totalorder %s157_s21, %s299_s0 }
   0x7   :  { %p163_p2 = pnand %p161_p1, %p158_p0 }
   0x9   :  { %166 = shalt.err (!%p163_p2)
}
   0xa   :  { %s167_s26 = scalar_lea.vmem %s24_s16, 128  ;;  %p172_p4 = scmp.lt.s32.totalorder %s24_s16, %s24_s16 }
   0xb   :  { %p168_p3 = scmp.ne.s32.totalorder %s24_s16, %s167_s26  ;;  %p173_p5 = scmp.lt.s32.totalorder %s167_s26, %s167_s26 }
   0xd   :  { %p174_p6 = por %p173_p5, %p172_p4 }
   0xf   :  { %p175_p7 = pnand %p174_p6, %p168_p3 }
  0x11   :  { %178 = shalt.err (!%p175_p7)
}
  0x12   :  { %26 = dma.hbm_to_vmem [thread:$0]  %s299_s0, 128, %s24_s16, [#allocation3]  }
  0x13   :  { %s179_s5 = scalar_lea.hbm %s300_s1, 128 }
  0x14   :  { %p180_p8 = scmp.ne.s32.totalorder %s300_s1, %s179_s5  ;;  %p183_p9 = scmp.lt.u32.totalorder %s179_s5, %s300_s1 }
  0x16   :  { %p185_p10 = pnand %p183_p9, %p180_p8 }
  0x18   :  { %188 = shalt.err (!%p185_p10)
}
  0x19   :  { %s189_s10 = scalar_lea.vmem %s39_s18, 128  ;;  %p194_p12 = scmp.lt.s32.totalorder %s39_s18, %s39_s18 }
  0x1a   :  { %p190_p11 = scmp.ne.s32.totalorder %s39_s18, %s189_s10  ;;  %p195_p13 = scmp.lt.s32.totalorder %s189_s10, %s189_s10 }
  0x1c   :  { %p196_p0 = por %p195_p13, %p194_p12 }
  0x1e   :  { %p197_p1 = pnand %p196_p0, %p190_p11 }
  0x20   :  { %200 = shalt.err (!%p197_p1)
}
  0x21   :  { %41 = dma.hbm_to_vmem [thread:$0]  %s300_s1, 128, %s39_s18, [#allocation6]  }
  0x22   :  { %223 = dma.done.wait [#allocation3], 128  }
  0x23   :  { %224 = vsyncadd [#allocation3], 4294967168 }
  0x24   :  { %225 = dma.done.wait [#allocation6], 128  }
  0x25   :  { %226 = vsyncadd [#allocation6], 4294967168  ;;  %v96_v0 = vld [vmem:[%s302_s3] sm:$0x3]  ;;  %vm103_vm0 = vcmask 254976   ;;  %v64_v25 = vld [vmem:[#allocation5] sm:$0xff]  ;;  %v77_v27 = vlaneseq }
  0x26   :  { %v100_v1 = vmul.f32 1.442695, %v96_v0  ;;  %v95_v2 = vld [vmem:[%s301_s2] sm:$0x3]  ;;  %v97_v3 = vadd.f32 1.0, %v96_v0  ;;  %s231_s3 = smov [#allocation7]  }
  0x27   :  { %v98_v4 = vmul.f32 %v95_v2, %v95_v2  ;;  %v63_v16 = vld [vmem:[#allocation2] sm:$0xff]  ;;  %v78_v29 = vshrl.u32 %v77_v27, 7  ;;  %v117_v30 = vand.u32 127, %v77_v27  ;;  %s131_s16 = sshll.u32 %s231_s3, 4  ;;  %s132_s16 = int_to_ptr.vmem [resolvable:$true] %s131_s16 }
  0x28   :  { %151 = vpow2.f32 %v100_v1  ;;  %v68_v17 = vsub.f32 1.0, %v63_v16  ;;  %s201_s17 = scalar_lea.vmem %s132_s16, 128  ;;  %p206_p3 = scmp.lt.s32.totalorder %s132_s16, %s132_s16 }
  0x29   :  { %v99_v5 = vsub.f32 %v97_v3, %v98_v4  ;;  %153 = vlog2.f32 %v63_v16  ;;  %vm115_vm1 = vcmp.eq.s32.totalorder %v78_v29, 0  ;;  %vm118_vm2 = vcmp.eq.s32.totalorder %v117_v30, 0  ;;  %p202_p2 = scmp.ne.s32.totalorder %s132_s16, %s201_s17  ;;  %p207_p4 = scmp.lt.s32.totalorder %s201_s17, %s201_s17 }
  0x2a   :  { %155 = vlog2.f32 %v68_v17  ;;  %vm119_vm3 = vmand %vm115_vm1, %vm118_vm2 }
  0x2b   :  { %p208_p5 = por %p207_p4, %p206_p3 }
  0x2d   :  { %p209_p6 = pnand %p208_p5, %p202_p2 }
  0x32   :  { %v152_v6 = vpop.eup %151 }
  0x33   :  { %v102_v7 = vsub.f32 %v99_v5, %v152_v6  ;;  %v154_v18 = vpop.eup %153 }
  0x34   :  { %v156_v19 = vpop.eup %155  ;;  %v66_v20 = vmul.f32 0.6931472, %v154_v18 }
  0x35   :  { %v104_v8 = vsel %vm103_vm0, %v102_v7, 0.0  ;;  %v70_v21 = vmul.f32 0.6931472, %v156_v19 }
  0x36   :  { %105 = vadd.xlane.f32.xlu0 %v104_v8  ;;  %v67_v22 = vmax.f32 %v66_v20, -100.0 }
  0x37   :  { %v71_v23 = vmax.f32 %v70_v21, -100.0 }
  0x39   :  { %v72_v24 = vsub.f32 %v67_v22, %v71_v23 }
  0x3b   :  { %v73_v26 = vmul.f32 %v72_v24, %v64_v25 }
  0x3d   :  { %v74_v28 = vadd.f32 %v73_v26, %v71_v23 }
  0x3f   :  { %v87_v31 = vmul.f32 -0.0625, %v74_v28 }
  0xc3   :  { %v106_v9 = vpop.xlane.xlu0 %105 }
  0xc4   :  { %v107_v10 = vrot.slane %v106_v9, 4 }
  0xc6   :  { %v108_v11 = vadd.f32 %v107_v10, %v106_v9 }
  0xc8   :  { %v109_v12 = vrot.slane %v108_v11, 2 }
  0xca   :  { %v110_v13 = vadd.f32 %v109_v12, %v108_v11 }
  0xcc   :  { %v111_v14 = vrot.slane %v110_v13, 1 }
  0xce   :  { %v112_v15 = vadd.f32 %v111_v14, %v110_v13 }
  0xd0   :  { %145 = vpush %v112_v15 }
 0x101   :  { %s146_s1 = spop %145 }
 0x102   :  { %s114_s2 = smul.f32 -0.5, %s146_s1 }
 0x104   :  { %v121_v32 = vstv %s114_s2 }
 0x105   :  { %v122_v33 = vsel %vm119_vm3, %v121_v32, 0.0 }
 0x106   :  { %v123_v34 = vadd.f32 %v122_v33, %v87_v31 }
 0x108   :  { %124 = vst [vmem:[#allocation7] sm:$0xff] %v123_v34 }
 0x109   :  { %212 = shalt.err (!%p209_p6)
}
 0x10a   :  { %s213_s20 = scalar_lea.hbm %s303_s4, 128 }
 0x10b   :  { %p214_p7 = scmp.ne.s32.totalorder %s303_s4, %s213_s20  ;;  %p217_p8 = scmp.lt.u32.totalorder %s213_s20, %s303_s4 }
 0x10d   :  { %p219_p9 = pnand %p217_p8, %p214_p7 }
 0x10f   :  { %222 = shalt.err (!%p219_p9)
}
 0x110   :  { %134 = dma.vmem_to_hbm [thread:$0]  %s132_s16, 128, %s303_s4, [#allocation4]  }
 0x111   :  { %227 = dma.done.wait [#allocation4], 128  }
 0x112   :  { %228 = vsyncadd [#allocation4], 4294967168 }
 0x113   :  { %138 = vsyncpa [#allocation3], 1 }
 0x114   :  { %139 = vsyncpa [#allocation6], 1 }
 0x115   :  { %140 = vsyncpa [#allocation4], 1 }

</bundles_post_ra>
